<compile_context>
chip_gen: v6e
topology: v6e:2x2x1
jax: 0.10.0
libtpu: 0.0.40
codegen_flags: <defaults>
</compile_context>

<pallas_src>
import jax
import jax.numpy as jnp
from jax import lax
from jax.experimental import pallas as pl
from jax.experimental.pallas import tpu as pltpu


def _make_cam_kernel(mm_dtype, n_chunk):
    """Build the kernel body for a given matmul dtype / lane chunk size."""

    def kernel(gamma_ref, x_ref, o_ref):
        # gamma_ref: SMEM (1,) f32 ;  x_ref / o_ref: VMEM (Bt, C, N_pad) f32
        gamma = gamma_ref[0]
        n_pad = x_ref.shape[-1]
        n_steps = n_pad // n_chunk

        @pl.when(gamma == 0.0)
        def _():
            # nn.Parameter(torch.zeros(1)) init: gamma*out + x == x exactly.
            o_ref[...] = x_ref[...]

        @pl.when(gamma != 0.0)
        def _():
            # Cast matmul operands to mm_dtype (bf16 by default -> bf16-native
            # MXU on v5e/v6e/v7x) in-kernel, so the softmax and the residual
            # add stay in exact f32.
            x_mm = x_ref[...].astype(mm_dtype)                   # (Bt, C, N)

            # energy[b] = X[b] @ X[b]^T : contract the lane dim of both
            # operands directly (no explicit transpose materialized).
            energy = lax.dot_general(
                x_mm, x_mm,
                dimension_numbers=(((2,), (2,)), ((0,), (0,))),
                preferred_element_type=jnp.float32)              # (Bt, C, C)

            # PyTorch: softmax(rowmax(E) - E).  Softmax is shift-invariant, so
            # this equals exp(rowmin(E) - E) / rowsum(...): one cross-lane
            # reduction + one subtract, exponent <= 0 (numerically safe).
            e_exp = jnp.exp(jnp.min(energy, axis=-1, keepdims=True) - energy)
            denom = jnp.sum(e_exp, axis=-1, keepdims=True)
            attn = (e_exp / denom).astype(mm_dtype)              # (Bt, C, C)

            # out[b] = attention[b] @ X[b], computed per lane chunk so no full
            # (Bt, C, N) f32 temporary is live (raises the feasible Bt).
            def emit_chunk(start):
                xc = x_ref[:, :, pl.ds(start, n_chunk)]          # f32 chunk
                oc = lax.dot_general(
                    attn, xc.astype(mm_dtype),
                    dimension_numbers=(((2,), (1,)), ((0,), (0,))),
                    preferred_element_type=jnp.float32)
                o_ref[:, :, pl.ds(start, n_chunk)] = gamma * oc + xc

            if n_steps <= 8:
                for s in range(n_steps):                         # static unroll
                    emit_chunk(s * n_chunk)
            else:
                def body(i, carry):
                    emit_chunk(pl.multiple_of(i * n_chunk, n_chunk))
                    return carry
                lax.fori_loop(0, n_steps, body, 0)

    return kernel


def _vmem_capacity_bytes():
    try:
        return int(pltpu.get_tpu_info().vmem_capacity_bytes)
    except Exception:
        return 64 << 20  # conservative (v7x-sized) fallback


def _pick_lane_chunk(n_pad, max_chunk=512):
    """Largest multiple of 128 <= max_chunk that divides n_pad."""
    best, c = 128, 128
    while c <= min(max_chunk, n_pad):
        if n_pad % c == 0:
            best = c
        c += 128
    return best


def _pick_batch_tile(B, C, n_pad, mm_itemsize, budget_bytes):
    """Largest divisor of B (capped at B//2 for megacore) fitting the budget."""

    def live_bytes(bt):
        slab = bt * C * n_pad
        return (4 * slab * 4           # double-buffered f32 in + out tiles
                + slab * mm_itemsize   # in-kernel matmul-dtype copy
                + 6 * bt * C * C * 4   # energy / exp / attn intermediates
                + (1 << 20))           # chunk temporaries + headroom

    cap_bt = B if B < 2 else max(1, B // 2)  # >=2 grid steps -> both v7x TCs
    best = 1
    for bt in range(1, cap_bt + 1):
        if B % bt == 0 and live_bytes(bt) <= budget_bytes:
            best = bt
    return best, live_bytes(best)


def cam_module(x, gamma, matmul_dtype=jnp.bfloat16):
    """x: (B, C, H, W, channle) float32;  gamma: (1,) float32."""
    B, C, H, W, CH = x.shape
    N = H * W * CH
    x_flat = x.reshape(B, C, N).astype(jnp.float32)

    # Lane (last) dim must be a multiple of 128 for unmasked stores.  Zero
    # padding is exact: padded columns add 0 to the gram matrix and stay 0 in
    # the padded output columns, which are sliced off.
    N_pad = ((N + 127) // 128) * 128
    if N_pad != N:
        # TODO(synk): mask the last lane block inside the kernel instead of
        # jnp.pad + slice (each is an extra HBM pass) when N % 128 != 0.
        x_flat = jnp.pad(x_flat, ((0, 0), (0, 0), (0, N_pad - N)))

    # Generation-aware VMEM budgeting: 128 MiB on v5e/v6e, 64 MiB on v7x.
    vmem_cap = _vmem_capacity_bytes()
    if vmem_cap >= (100 << 20):
        budget, limit_cap = 14 << 20, 96 << 20   # v5e / v6e
    else:
        budget, limit_cap = 6 << 20, 44 << 20    # v7x (or unknown backend)

    mm_itemsize = jnp.dtype(matmul_dtype).itemsize
    Bt, live = _pick_batch_tile(B, C, N_pad, mm_itemsize, budget)
    # TODO(synk): add a two-pass N-tiled path (accumulate the (C,C) gram over
    # lane tiles, then re-stream tiles for attn @ X) for shapes where even a
    # single-batch slab exceeds the VMEM budget.
    vmem_limit = int(min(max(16 << 20, live + (4 << 20)), limit_cap))

    n_chunk = _pick_lane_chunk(N_pad)
    kernel = _make_cam_kernel(matmul_dtype, n_chunk)

    out_flat = pl.pallas_call(
        kernel,
        out_shape=jax.ShapeDtypeStruct((B, C, N_pad), jnp.float32),
        grid_spec=pltpu.PrefetchScalarGridSpec(
            num_scalar_prefetch=0,
            grid=(B // Bt,),
            in_specs=[
                pl.BlockSpec(memory_space=pltpu.MemorySpace.SMEM),    # gamma
                pl.BlockSpec((Bt, C, N_pad), lambda b: (b, 0, 0)),    # x
            ],
            out_specs=pl.BlockSpec((Bt, C, N_pad), lambda b: (b, 0, 0)),
        ),
        compiler_params=pltpu.CompilerParams(
            dimension_semantics=("parallel",),
            vmem_limit_bytes=vmem_limit,
        ),
    )(gamma.astype(jnp.float32), x_flat)

    if N_pad != N:
        out_flat = out_flat[:, :, :N]
    return out_flat.reshape(B, C, H, W, CH)


def _reference_f32(x, gamma):
    """Pure-JAX mirror of the PyTorch forward, full f32 precision."""
    B, C = x.shape[0], x.shape[1]
    q = x.reshape(B, C, -1)
    energy = jnp.einsum("bcn,bdn->bcd", q, q,
                        precision=jax.lax.Precision.HIGHEST)
    energy_new = jnp.max(energy, axis=-1, keepdims=True) - energy
    attn = jax.nn.softmax(energy_new, axis=-1)
    out = jnp.einsum("bcd,bdn->bcn", attn, q,
                     precision=jax.lax.Precision.HIGHEST)
    return (gamma[0] * out).reshape(x.shape) + x


def _reference_mixed(x, gamma, mm_dtype):
    """Mirror of the kernel's mixed-precision schedule (bf16 matmul operands,
    f32 accumulation, f32 softmax + residual)."""
    B, C = x.shape[0], x.shape[1]
    q = x.reshape(B, C, -1).astype(jnp.float32)
    qm = q.astype(mm_dtype)
    energy = jnp.einsum("bcn,bdn->bcd", qm, qm,
                        preferred_element_type=jnp.float32)
    e_exp = jnp.exp(jnp.min(energy, axis=-1, keepdims=True) - energy)
    attn = (e_exp / jnp.sum(e_exp, axis=-1, keepdims=True)).astype(mm_dtype)
    out = jnp.einsum("bcd,bdn->bcn", attn, qm,
                     preferred_element_type=jnp.float32)
    return (gamma[0] * out).reshape(x.shape) + x


if __name__ == "__main__":
    B, C, H, W, CH = 2, 4, 8, 8, 4    # N = H*W*CH = 256 (multiple of 128)

    key = jax.random.PRNGKey(0)
    # Moderate scale keeps the channel softmax away from one-hot saturation so
    # cross-precision comparisons stay meaningful.
    x = 0.1 * jax.random.normal(key, (B, C, H, W, CH), dtype=jnp.float32)

    # 1) gamma = 0 (the nn.Parameter(torch.zeros(1)) init): exact copy path.
    gamma0 = jnp.zeros((1,), dtype=jnp.float32)
    out0 = jax.block_until_ready(cam_module(x, gamma0))
    assert out0.shape == x.shape
    assert jnp.allclose(out0, x, atol=1e-6, rtol=0.0), "mismatch (gamma=0)"

    gamma1 = jnp.array([0.5], dtype=jnp.float32)

    # 2) f32 matmul path vs the full-precision PyTorch-equivalent reference.
    out_f32 = jax.block_until_ready(
        cam_module(x, gamma1, matmul_dtype=jnp.float32))
    ref_f32 = _reference_f32(x, gamma1)
    assert jnp.allclose(out_f32, ref_f32, atol=5e-3, rtol=5e-3), \
        "mismatch (gamma=0.5, f32 matmuls)"

    # 3) default bf16-MXU path: check against the mixed-precision mirror and
    #    (loosely) against the f32 reference.
    out_bf16 = jax.block_until_ready(cam_module(x, gamma1))
    ref_mixed = _reference_mixed(x, gamma1, jnp.bfloat16)
    assert jnp.allclose(out_bf16, ref_mixed, atol=1e-2, rtol=1e-2), \
        "mismatch (gamma=0.5, bf16 matmuls vs mixed-precision mirror)"
    assert jnp.allclose(out_bf16, ref_f32, atol=2e-2, rtol=2e-2), \
        "mismatch (gamma=0.5, bf16 matmuls vs f32 reference)"

    print("KERNEL_OK")
</pallas_src>

<mosaic_0001>
module attributes {stable_mosaic.version = 11 : i64} {
  func.func @kernel(%arg0: i32, %arg1: memref<1xf32, #tpu.memory_space<smem>>, %arg2: memref<1x4x256xf32, #tpu.memory_space<vmem>>, %arg3: memref<1x4x256xf32, #tpu.memory_space<vmem>>) attributes {dimension_semantics = [#tpu.dimension_semantics<parallel>], iteration_bounds = array<i64: 2>, scalar_prefetch = 0 : i64, scratch_operands = 0 : i64, tpu.core_type = #tpu.core_type<tc>, window_params = [{transform_indices = @transform_0, window_bounds = array<i64: 1>}, {transform_indices = @transform_1, window_bounds = array<i64: 1, 4, 256>}, {transform_indices = @transform_2, window_bounds = array<i64: 1, 4, 256>}]} {
    %c0 = arith.constant 0 : index
    %0 = memref.load %arg1[%c0] : memref<1xf32, #tpu.memory_space<smem>>
    %cst = arith.constant 0.000000e+00 : f32
    %1 = arith.cmpf oeq, %0, %cst : f32
    %2 = arith.extui %1 : i1 to i32
    %c0_i32 = arith.constant 0 : i32
    %3 = arith.cmpi ne, %2, %c0_i32 : i32
    scf.if %3 {
      %c0_2 = arith.constant 0 : index
      %c0_3 = arith.constant 0 : index
      %c0_4 = arith.constant 0 : index
      %7 = vector.load %arg2[%c0_2, %c0_3, %c0_4] : memref<1x4x256xf32, #tpu.memory_space<vmem>>, vector<1x4x256xf32>
      %c0_5 = arith.constant 0 : index
      %c0_6 = arith.constant 0 : index
      %c0_7 = arith.constant 0 : index
      %8 = vector.load %arg3[%c0_5, %c0_6, %c0_7] : memref<1x4x256xf32, #tpu.memory_space<vmem>>, vector<1x4x256xf32>
      tpu.vector_store %arg3[%c0_5, %c0_6, %c0_7], %7 {strides = array<i32>} : memref<1x4x256xf32, #tpu.memory_space<vmem>>, vector<1x4x256xf32>,
    } else {
    }
    %cst_0 = arith.constant 0.000000e+00 : f32
    %4 = arith.cmpf one, %0, %cst_0 : f32
    %5 = arith.extui %4 : i1 to i32
    %c0_i32_1 = arith.constant 0 : i32
    %6 = arith.cmpi ne, %5, %c0_i32_1 : i32
    scf.if %6 {
      %c0_2 = arith.constant 0 : index
      %c0_3 = arith.constant 0 : index
      %c0_4 = arith.constant 0 : index
      %7 = vector.load %arg2[%c0_2, %c0_3, %c0_4] : memref<1x4x256xf32, #tpu.memory_space<vmem>>, vector<1x4x256xf32>
      %8 = arith.truncf %7 : vector<1x4x256xf32> to vector<1x4x256xbf16>
      %cst_5 = arith.constant dense<0.000000e+00> : vector<1x4x4xf32>
      %9 = tpu.matmul %8, %8, %cst_5 {dimension_numbers = #tpu.dot_dimension_numbers<[2], [2], [1], [1], [0, 0, 0, 1, 1, 1], [0], [0]>} : vector<1x4x256xbf16>, vector<1x4x256xbf16>, vector<1x4x4xf32> -> vector<1x4x4xf32>
      %cst_6 = arith.constant dense<0x7F800000> : vector<1x4xf32>
      %10 = vector.multi_reduction <minimumf>, %9, %cst_6 [2] : vector<1x4x4xf32> to vector<1x4xf32>
      %11 = vector.shape_cast %10 : vector<1x4xf32> to vector<1x4x1xf32>
      %12 = vector.broadcast %11 : vector<1x4x1xf32> to vector<1x4x4xf32>
      %13 = arith.subf %12, %9 : vector<1x4x4xf32>
      %14 = math.exp %13 : vector<1x4x4xf32>
      %cst_7 = arith.constant dense<0.000000e+00> : vector<1x4xf32>
      %15 = vector.multi_reduction <add>, %14, %cst_7 [2] : vector<1x4x4xf32> to vector<1x4xf32>
      %16 = vector.shape_cast %15 : vector<1x4xf32> to vector<1x4x1xf32>
      %17 = vector.broadcast %16 : vector<1x4x1xf32> to vector<1x4x4xf32>
      %18 = arith.divf %14, %17 : vector<1x4x4xf32>
      %19 = arith.truncf %18 : vector<1x4x4xf32> to vector<1x4x4xbf16>
      %c0_8 = arith.constant 0 : index
      %c0_9 = arith.constant 0 : index
      %c0_10 = arith.constant 0 : index
      %20 = vector.load %arg2[%c0_8, %c0_9, %c0_10] : memref<1x4x256xf32, #tpu.memory_space<vmem>>, vector<1x4x256xf32>
      %21 = arith.truncf %20 : vector<1x4x256xf32> to vector<1x4x256xbf16>
      %cst_11 = arith.constant dense<0.000000e+00> : vector<1x4x256xf32>
      %22 = tpu.matmul %19, %21, %cst_11 {dimension_numbers = #tpu.dot_dimension_numbers<[2], [1], [1], [2], [0, 0, 0, 1, 1, 2], [0], [0]>} : vector<1x4x4xbf16>, vector<1x4x256xbf16>, vector<1x4x256xf32> -> vector<1x4x256xf32>
      %23 = vector.broadcast %0 : f32 to vector<1x4x256xf32>
      %24 = arith.mulf %23, %22 : vector<1x4x256xf32>
      %25 = arith.addf %24, %20 : vector<1x4x256xf32>
      %c0_12 = arith.constant 0 : index
      %c0_13 = arith.constant 0 : index
      %c0_14 = arith.constant 0 : index
      %26 = vector.load %arg3[%c0_12, %c0_13, %c0_14] : memref<1x4x256xf32, #tpu.memory_space<vmem>>, vector<1x4x256xf32>
      tpu.vector_store %arg3[%c0_12, %c0_13, %c0_14], %25 {strides = array<i32>} : memref<1x4x256xf32, #tpu.memory_space<vmem>>, vector<1x4x256xf32>,
    } else {
    }
    return
  }
  func.func @transform_0(%arg0: i32) -> i32 {
    %c0_i32 = arith.constant 0 : i32
    %c0_i32_0 = arith.constant 0 : i32
    return %c0_i32 : i32
  }
  func.func @transform_1(%arg0: i32) -> (i32, i32, i32) {
    %c0_i32 = arith.constant 0 : i32
    %c0_i32_0 = arith.constant 0 : i32
    %c0_i32_1 = arith.constant 0 : i32
    return %arg0, %c0_i32, %c0_i32_0 : i32, i32, i32
  }
  func.func @transform_2(%arg0: i32) -> (i32, i32, i32) {
    %c0_i32 = arith.constant 0 : i32
    %c0_i32_0 = arith.constant 0 : i32
    %c0_i32_1 = arith.constant 0 : i32
    return %arg0, %c0_i32, %c0_i32_0 : i32, i32, i32
  }
}

</mosaic_0001>

<bundles_post_ra>
// kernel: tpu_custom_call.1
= control target key start
LH: loop header
LB: loop body
LE: loop exit
PB: predicated region body
PF: predicated region fallthrough
CT: control target
= control target key end

     0   :  { %s715_s0 = inlined_call_operand.<no memory space> [shape: f32[1], index: 0, kind: input, shape index: {}]   ;;  %s716_s1 = inlined_call_operand.hbm [shape: f32[2,4,256], index: 1, kind: input, shape index: {}]   ;;  %s717_s2 = inlined_call_operand.hbm [shape: f32[2,4,256], index: 2, kind: output, shape index: {}]  }
   0x1   :  { %7 = sst [smem:[#allocation2]] %s715_s0 }
   0x2   :  { %8 = vsyncpa [#allocation4], 0 }
   0x3   :  { %10 = vsyncpa [#allocation4 + $0x1], 0 }
   0x4   :  { %11 = vsyncpa [#allocation5], 0 }
   0x5   :  { %13 = vsyncpa [#allocation5 + $0x1], 0  ;;  %s564_s11 = smov 0   ;;  %s566_s12 = smov 0  }
   0x6   :  { %s568_s13 = smov 0   ;;  %s570_s14 = smov 0  }
   0x7 LB: > { %s585_s0 = sadd.s32 4294967295, %s541_s14   ;;  %s379_s15 = sadd.s32 4294967294, %s541_s14   ;;  %s541_s14 = sphi %s570_s14, %s734_s14   ;;  %s537_s13 = sphi %s568_s13, %s733_s13   ;;  %s533_s12 = sphi %s566_s12, %s732_s12   ;;  %s529_s11 = sphi %s564_s11, %s731_s11  }
   0x8   : > { %s589_s16 = sadd.s32 1, %s541_s14   ;;  %s47_s17 = sadd.s32 1, %s537_s13 }
   0x9   : > { %s44_s18 = ssub.s32 %s541_s14, %s589_s16  ;;  %p54_p0 = scmp.ne.s32.totalorder %s537_s13, %s533_s12 }
   0xa   : > { %p45_p1 = scmp.eq.s32.totalorder %s44_s18, 0  ;;  %p55_p2 = scmp.eq.s32.totalorder %s541_s14, 0 }
   0xb   : > { %p60_p3 = scmp.ne.s32.totalorder %s533_s12, %s529_s11  ;;  %p61_p4 = scmp.eq.s32.totalorder %s585_s0, 0 }
   0xc   : > { %s601_s19 = scalar_select %p45_p1, %s537_s13, %s47_s17  }
   0xd   : > { %p603_p5 = por %p55_p2, %p54_p0  ;;  %p607_p6 = por %p61_p4, %p60_p3 }
   0xe   : > { %p84_p7 = scmp.eq.s32.totalorder %s585_s0, 1  ;;  %p90_p8 = scmp.eq.s32.totalorder %s379_s15, 1 }
   0xf   : > { %s721_s21 = scalar_select %p607_p6, 1, 0 }
  0x10   : > { %p409_p10 = scmp.lt.s32.totalorder %s541_s14, 2  ;;  %p614_p11 = por %p84_p7, %p54_p0 }
  0x11   : > { %p618_p12 = por %p90_p8, %p60_p3  ;;  %s113_s24 = sand.u32 1, %s537_s13  }
  0x12   : > { %s722_s22 = scalar_select %p614_p11, 1, 0 }
  0x13   : > { %s723_s23 = scalar_select %p618_p12, 1, 0 }
  0x14   : > { %s395_s25 = sshll.u32 %s541_s14, 7  ;;  %s382_s26 = sshll.u32 %s113_s24, 3 }
  0x15   : > { %s627_s29 = scalar_lea.hbm %s716_s1, %s395_s25  ;;  %s117_s30 = scalar_lea.vmem [#allocation3], %s382_s26 }
  0x16   : > { %s125_s3 = sshll.u32 %s117_s30, 4  ;;  %p631_p13 = pnand %p409_p10, %p603_p5  ;;  %s635_s3 = int_to_ptr.vmem [resolvable:$true] %s125_s3 }
  0x17   : > { %s114_s5 = scalar_lea.sflag [#allocation4], %s113_s24  ;;  %s449_s6 = scalar_lea.hbm %s627_s29, 128 }
  0x18   : > { %p450_p2 = scmp.ne.s32.totalorder %s627_s29, %s449_s6  ;;  %p451_p3 = pneg %p631_p13 }
  0x19   : > { %s454_s9 = scalar_lea.hbm %s716_s1, 256  ;;  %p455_p5 = scmp.lt.s32.totalorder %s627_s29, %s716_s1 }
  0x1a   : > { %p452_p4 = pnand %p451_p3, %p450_p2  ;;  %p456_p8 = scmp.lt.s32.totalorder %s454_s9, %s449_s6 }
  0x1c   : > { %p453_p7 = pneg %p452_p4  ;;  %p457_p10 = por %p456_p8, %p455_p5 }
  0x1e   : > { %p458_p9 = pnand %p457_p10, %p453_p7 }
  0x20   : > { %461 = shalt.err (!%p458_p9)
}
  0x21   : > { %s462_s17 = scalar_lea.vmem %s635_s3, 128  ;;  %s543_s18 = smov [#allocation3]  }
  0x22   : > { %p463_p0 = scmp.ne.s32.totalorder %s635_s3, %s462_s17  ;;  %s467_s20 = sshll.u32 %s543_s18, 4  ;;  %s468_s20 = int_to_ptr.vmem [resolvable:$false] %s467_s20 }
  0x23   : > { %s469_s24 = scalar_lea.vmem %s468_s20, 256  ;;  %p470_p4 = scmp.lt.s32.totalorder %s635_s3, %s468_s20 }
  0x24   : > { %p465_p1 = pnand %p463_p0, %p451_p3  ;;  %p471_p12 = scmp.lt.s32.totalorder %s469_s24, %s462_s17 }
  0x26   : > { %p466_p2 = pneg %p465_p1  ;;  %p472_p11 = por %p471_p12, %p470_p4 }
  0x28   : > { %p473_p6 = pnand %p472_p11, %p466_p2 }
  0x2a   : > { %476 = shalt.err (!%p473_p6)
}
  0x2b   : > { %404 = dma.hbm_to_vmem [thread:$0]  (!%p631_p13), %s627_s29, 128, %s635_s3, %s114_s5  }
  0x2c   : > { %p725_p9 = scmp.lt.s32.totalorder %s541_s14, 3  ;;  %p726_p7 = scmp.ge.s32.totalorder %s541_s14, 1 }
  0x2e   : > { %p131_p0 = pnand %p726_p7, %p725_p9 }
  0x2f   : > { %s662_s25 = sand.u32 (!%p131_p0), 1, %s533_s12   ;;  %p727_p6 = scmp.ne.s32.totalorder (!%p131_p0), %s721_s21, 0 }
  0x30   : > { %134 = sbr.rel (%p131_p0) target bundleno = 814 (0x32e), region = 28  ;;  %s386_s26 = sshll.u32 (!%p131_p0), %s662_s25, 3 }
  0x31   : > { %s137_s27 = scalar_lea.sflag (!%p131_p0), [#allocation4], %s662_s25  ;;  %s140_s28 = scalar_lea.vmem (!%p131_p0), [#allocation3], %s386_s26 }
  0x35   : > { %520 = dma.done.wait (%p727_p6), %s137_s27, 128  }
  0x36   : > { %522 = vsyncadd (%p727_p6), %s137_s27, 4294967168  ;;  %s670_s30 = sld [smem:[#allocation2]]  ;;  %s673_s29 = scalar_lea.vmem [#allocation6], %s386_s26 }
  0x3c   : > { %p163_p11 = scmp.eq.f32.partialorder %s670_s30, 0.0 }
  0x3d   : > { %v167_v0 = vld [vmem:[%s140_s28] sm:$0xff] (%p163_p11) }
  0x3e   : > { %166 = sbr.rel (!%p163_p11) target bundleno = 67 (0x43), region = 36  ;;  %168 = vst [vmem:[%s673_s29] sm:$0xff] (%p163_p11), %v167_v0 }
  0x43 PF: > { %p169_p12 = scmp.ne.f32.partialorder %s670_s30, 0.0 }
  0x44   : > { %v173_v1 = vld [vmem:[%s140_s28] sm:$0xff] (%p169_p12)  ;;  %vm219_vm0 = vcmask (%p169_p12), 27648   ;;  %vm236_vm1 = vcmask (%p169_p12), 1041408   ;;  %v544_v16 = vmov (%p169_p12), 0   ;;  %vm232_vm2 = vcmask (%p169_p12), 31744  }
  0x45   : > { %172 = sbr.rel (!%p169_p12) target bundleno = 790 (0x316), region = 40  ;;  %v175_v2 = vcombine.high (%p169_p12), %v173_v1, %v173_v1  ;;  %v177_v3 = vpack.c.bf16 (%p169_p12), %v173_v1, %v173_v1  ;;  %275 = vmatprep.mubr.bf16.mxu1 (%p169_p12), %v544_v16  ;;  %v284_v21 = vstv (%p169_p12), %s670_s30 }
  0x47   : > { %v178_v4 = vpack.c.bf16 (%p169_p12), %v175_v2, %v175_v2  ;;  %v238_v15 = vsel (%p169_p12), %vm236_vm1, %v177_v3, 0 }
  0x49   : > { %193 = vmatprep.subr.bf16.mxu0 (%p169_p12), %v178_v4  ;;  %211 = vmatprep.mubr.bf16.mxu0 (%p169_p12), %v178_v4 }
  0x4a   : > { %194 = vmatpush1.bf16.xpose.msra.mxu0 %v177_v3  ;;  %388 = vmatprep.subr.msk.bf16.mxu1 %vm236_vm1, %v178_v4 }
  0x4b   : > { %258 = vmatpush1.bf16.msra.mxu1 %v238_v15 }
  0x51   : > { %212 = vmatmul.mubr.bf16.vlgmr.msra.gmra.mxu0 %v177_v3 }
 0x111   : > { %v213_v5 = vpop.f32.mrf.mxu0 }
 0x112   : > { %v220_v6 = vsel %vm219_vm0, %v213_v5, inf }
 0x113   : > { %221 = vmin.xlane.f32.xlu0 %v220_v6  ;;  %v215_v7 = vpop.f32.mrf.mxu0 }
 0x115   : > { %v216_v8 = vpop.f32.mrf.mxu0 }
 0x117   : > { %v217_v9 = vpop.f32.mrf.mxu0 }
 0x19c   : > { %v222_v10 = vpop.xlane.xlu0 %221 }
 0x19d   : > { %v223_v11 = vsub.f32 %v222_v10, %v213_v5 }
 0x19f   : > { %v224_v12 = vmul.f32 1.442695, %v223_v11 }
 0x1a1   : > { %445 = vpow2.f32 %v224_v12 }
 0x1ae   : > { %v446_v13 = vpop.eup %445 }
 0x1af   : > { %v226_v14 = vsel %vm219_vm0, %v446_v13, 0.0 }
 0x1b0   : > { %227 = vadd.xlane.f32.xlu0 %v226_v14 }
 0x239   : > { %v228_v17 = vpop.xlane.xlu0 %227 }
 0x23a   : > { %447 = vrcp.f32 %v228_v17 }
 0x247   : > { %v448_v18 = vpop.eup %447 }
 0x248   : > { %v230_v19 = vmul.f32 %v448_v18, %v446_v13 }
 0x24a   : > { %v231_v20 = vpack.c.bf16 %v230_v19, %v230_v19 }
 0x24c   : > { %389 = vmatmul.mubr.msk.bf16.vlgmr.msra.gmra.mxu1 %vm232_vm2, %v231_v20 }
 0x30c   : > { %v277_v22 = vpop.f32.mrf.mxu1 }
 0x30d   : > { %v285_v23 = vmul.f32 %v284_v21, %v277_v22 }
 0x30e   : > { %v279_v24 = vpop.f32.mrf.mxu1 }
 0x30f   : > { %v286_v25 = vmul.f32 %v284_v21, %v279_v24  ;;  %v287_v27 = vadd.f32 %v285_v23, %v173_v1 }
 0x310   : > { %v281_v26 = vpop.f32.mrf.mxu1 }
 0x311   : > { %v288_v28 = vadd.f32 %v286_v25, %v175_v2 }
 0x312   : > { %v282_v29 = vpop.f32.mrf.mxu1 }
 0x313   : > { %v291_v30 = vcombine.low %v287_v27, %v288_v28 }
 0x315   : > { %293 = vst [vmem:[%s673_s29] sm:$0xff] %v291_v30 }
 0x316 PF: > { %s396_s21 = sshll.u32 %s585_s0, 7  ;;  %s309_s6 = sshll.u32 %s673_s29, 4  ;;  %s310_s6 = int_to_ptr.vmem [resolvable:$true] %s309_s6 }
 0x317   : > { %s307_s5 = scalar_lea.hbm %s717_s2, %s396_s21  ;;  %s295_s7 = scalar_lea.sflag [#allocation5], %s662_s25 }
 0x318   : > { %s477_s8 = scalar_lea.vmem %s310_s6, 128  ;;  %p728_p1 = scmp.ne.s32.totalorder %s722_s22, 0 }
 0x319   : > { %p478_p13 = scmp.ne.s32.totalorder %s310_s6, %s477_s8  ;;  %s545_s9 = smov [#allocation6]  }
 0x31a   : > { %s481_s10 = sshll.u32 %s545_s9, 4  ;;  %s482_s10 = int_to_ptr.vmem [resolvable:$false] %s481_s10 }
 0x31b   : > { %p479_p3 = pnand %p478_p13, %p728_p1  ;;  %s483_s15 = scalar_lea.vmem %s482_s10, 256 }
 0x31c   : > { %p484_p8 = scmp.lt.s32.totalorder %s310_s6, %s482_s10  ;;  %p485_p10 = scmp.lt.s32.totalorder %s483_s15, %s477_s8 }
 0x31d   : > { %p480_p5 = pneg %p479_p3 }
 0x31e   : > { %p486_p2 = por %p485_p10, %p484_p8 }
 0x320   : > { %p487_p4 = pnand %p486_p2, %p480_p5 }
 0x322   : > { %490 = shalt.err (!%p487_p4)
}
 0x323   : > { %s491_s0 = scalar_lea.hbm %s307_s5, 128  ;;  %s495_s20 = scalar_lea.hbm %s717_s2, 256 }
 0x324   : > { %p492_p9 = scmp.ne.s32.totalorder %s307_s5, %s491_s0  ;;  %p496_p6 = scmp.lt.s32.totalorder %s307_s5, %s717_s2 }
 0x325   : > { %p497_p11 = scmp.lt.s32.totalorder %s495_s20, %s491_s0 }
 0x326   : > { %p493_p7 = pnand %p492_p9, %p728_p1 }
 0x327   : > { %p498_p12 = por %p497_p11, %p496_p6 }
 0x328   : > { %p494_p0 = pneg %p493_p7 }
 0x32a   : > { %p499_p13 = pnand %p498_p12, %p494_p0 }
 0x32c   : > { %502 = shalt.err (!%p499_p13)
}
 0x32d   : > { %399 = dma.vmem_to_hbm [thread:$0]  (%p728_p1), %s310_s6, 128, %s307_s5, %s295_s7  }
 0x32e PF: > { %s321_s26 = sand.u32 1, %s529_s11   ;;  %p729_p3 = scmp.ne.s32.totalorder %s723_s23, 0 }
 0x32f   : > { %p730_p5 = scmp.ge.s32.totalorder %s541_s14, 2  ;;  %s322_s27 = scalar_lea.sflag [#allocation5], %s321_s26 }
 0x331   : > { %p406_p8 = pnand %p730_p5, %p729_p3 }
 0x333   : > { %p407_p10 = pneg %p406_p8 }
 0x335   : > { %524 = dma.done.wait (%p407_p10), %s322_s27, 128  }
 0x336   : > { %526 = vsyncadd (%p407_p10), %s322_s27, 4294967168  ;;  %p16_p2 = scmp.ge.s32.totalorder %s589_s16, 4   ;;  %s731_s11 = smov %s533_s12 }
 0x337   : > { %s732_s12 = smov %s537_s13  ;;  %s733_s13 = smov %s601_s19 }
 0x338   : > { %s734_s14 = smov %s589_s16  ;;  %18 = sbr.rel (!%p16_p2) target bundleno = 7 (0x7), region = 81 }
 0x33d   :  { %327 = vsyncpa [#allocation4], 1 }
 0x33e   :  { %329 = vsyncpa [#allocation4 + $0x1], 1 }
 0x33f   :  { %330 = vsyncpa [#allocation5], 1 }
 0x340   :  { %332 = vsyncpa [#allocation5 + $0x1], 1 }

</bundles_post_ra>
